<compile_context>
chip_gen: v7x
topology: tpu7x:2x2x1
jax: 0.10.0
libtpu: 0.0.40
codegen_flags: <defaults>
</compile_context>

<pallas_src>
import functools

import jax
import jax.numpy as jnp
from jax.experimental import pallas as pl
from jax.experimental.pallas import tpu as pltpu

BETA = 0.9      # membrane decay
THRESH = 1.0    # firing threshold


def _snn_kernel(x_ref, w1_ref, b1_ref, w2_ref, b2_ref, out_ref,
                *, T: int, B: int, record_spikes: bool):
    """Whole SNN forward (all timesteps, both layers) in one invocation.

    x_ref:  (T*B, N0) spikes, time folded into the row (sublane) dim
    w1_ref: (N0, N1)   b1_ref: (1, N1)
    w2_ref: (N1, N2)   b2_ref: (1, N2)
    out_ref:(T*B, N2)  last-layer spikes or membranes
    """
    N1, N2 = w2_ref.shape

    # ---- layer-1 matmul hoisted out of the recurrence (state-free) ---------
    x_all = x_ref[...]                                        # (T*B, N0)
    cur1_all = jnp.dot(x_all, w1_ref[...],
                       preferred_element_type=jnp.float32) + b1_ref[...]

    # Hoist weight/bias loads & broadcasts out of the unrolled time loop.
    w2 = w2_ref[...]
    b2 = jnp.broadcast_to(b2_ref[...], (B, N2))

    # Membrane state carried in registers (reset_mem() => zeros at t=0).
    mem1 = jnp.zeros((B, N1), jnp.float32)
    mem2 = jnp.zeros((B, N2), jnp.float32)

    # Statically unrolled recurrence over timesteps (T is small & static).
    for t in range(T):
        # ---- layer 1: LIF (Linear already done above) ----------------------
        cur1 = cur1_all[t * B:(t + 1) * B, :]
        m1 = BETA * mem1 + cur1
        s1 = (m1 >= THRESH).astype(jnp.float32)
        mem1 = m1 - s1 * THRESH                               # subtractive reset

        # ---- layer 2: Linear + LIF -----------------------------------------
        cur2 = jnp.dot(s1, w2, preferred_element_type=jnp.float32) + b2
        m2 = BETA * mem2 + cur2
        s2 = (m2 >= THRESH).astype(jnp.float32)
        mem2 = m2 - s2 * THRESH

        # VMEM store with static indices; HBM writeback happens once at the
        # end of the kernel for the whole (T*B, N2) block.
        out_ref[t * B:(t + 1) * B, :] = s2 if record_spikes else mem2


@functools.partial(jax.jit, static_argnames=("output",))
def spiking_net_forward(x, w1, b1, w2, b2, *, output="spike"):
    """x: (T, B, N0) spike train. Returns (T, B, N2) of spikes or membranes."""
    T, B, N0 = x.shape
    N1 = w1.shape[1]
    N2 = w2.shape[1]

    x2d = x.reshape(T * B, N0).astype(jnp.float32)   # fold time into rows
    b1r = b1.reshape(1, N1)
    b2r = b2.reshape(1, N2)

    kernel = functools.partial(
        _snn_kernel, T=T, B=B, record_spikes=(output == "spike"))

    out2d = pl.pallas_call(
        kernel,
        out_shape=jax.ShapeDtypeStruct((T * B, N2), jnp.float32),
        in_specs=[pl.BlockSpec(memory_space=pltpu.MemorySpace.VMEM)] * 5,
        out_specs=pl.BlockSpec(memory_space=pltpu.MemorySpace.VMEM),
    )(x2d, w1, b1r, w2, b2r)

    return out2d.reshape(T, B, N2)


def reference_forward(x, w1, b1, w2, b2, output="spike"):
    """Pure-JAX reference of the same semantics."""
    T, B, _ = x.shape
    mem1 = jnp.zeros((B, w1.shape[1]), jnp.float32)
    mem2 = jnp.zeros((B, w2.shape[1]), jnp.float32)
    spk_rec, mem_rec = [], []
    for t in range(T):
        cur1 = x[t] @ w1 + b1
        mem1 = BETA * mem1 + cur1
        s1 = (mem1 >= THRESH).astype(jnp.float32)
        mem1 = mem1 - s1 * THRESH
        cur2 = s1 @ w2 + b2
        mem2 = BETA * mem2 + cur2
        s2 = (mem2 >= THRESH).astype(jnp.float32)
        mem2 = mem2 - s2 * THRESH
        spk_rec.append(s2)
        mem_rec.append(mem2)
    return jnp.stack(spk_rec if output == "spike" else mem_rec, axis=0)


if __name__ == "__main__":
    # Network description (mirrors net_desc): layers=[64, 32, 16], timesteps=8.
    T, B = 8, 2
    N0, N1, N2 = 64, 32, 16

    key = jax.random.PRNGKey(0)
    k_data, k_spk, k_w1, k_b1, k_w2, k_b2 = jax.random.split(key, 6)

    # Deterministic "parameters" (PyTorch nn.Linear-style uniform fan-in init).
    lim1 = 1.0 / (N0 ** 0.5)
    lim2 = 1.0 / (N1 ** 0.5)
    w1 = jax.random.uniform(k_w1, (N0, N1), jnp.float32, -lim1, lim1)
    b1 = jax.random.uniform(k_b1, (N1,), jnp.float32, -lim1, lim1)
    w2 = jax.random.uniform(k_w2, (N1, N2), jnp.float32, -lim2, lim2)
    b2 = jax.random.uniform(k_b2, (N2,), jnp.float32, -lim2, lim2)

    # spikegen_fn: rate coding — Bernoulli spikes with probability = intensity,
    # done in plain JAX glue just like spikegen_fn runs outside the network in
    # the PyTorch module.
    data = jax.random.uniform(k_data, (B, N0), jnp.float32)   # intensities in [0,1)
    x = jax.random.bernoulli(k_spk, data, shape=(T, B, N0)).astype(jnp.float32)

    ok = True
    for mode in ("spike", "membrane"):
        out = spiking_net_forward(x, w1, b1, w2, b2, output=mode)
        out = jax.block_until_ready(out)
        ref = reference_forward(x, w1, b1, w2, b2, output=mode)
        assert out.shape == (T, B, N2)
        ok &= bool(jnp.allclose(out, ref, atol=1e-5))

    assert ok, "Pallas output mismatch vs reference"
    print("KERNEL_OK")
</pallas_src>

<mosaic_0001>
module attributes {stable_mosaic.version = 11 : i64} {
  func.func @_snn_kernel(%arg0: memref<16x64xf32, #tpu.memory_space<vmem>>, %arg1: memref<64x32xf32, #tpu.memory_space<vmem>>, %arg2: memref<1x32xf32, #tpu.memory_space<vmem>>, %arg3: memref<32x16xf32, #tpu.memory_space<vmem>>, %arg4: memref<1x16xf32, #tpu.memory_space<vmem>>, %arg5: memref<16x16xf32, #tpu.memory_space<vmem>>) attributes {dimension_semantics = [], scalar_prefetch = 0 : i64, scratch_operands = 0 : i64, tpu.core_type = #tpu.core_type<tc>} {
    %c0 = arith.constant 0 : index
    %c0_0 = arith.constant 0 : index
    %0 = vector.load %arg0[%c0, %c0_0] : memref<16x64xf32, #tpu.memory_space<vmem>>, vector<16x64xf32>
    %c0_1 = arith.constant 0 : index
    %c0_2 = arith.constant 0 : index
    %1 = vector.load %arg1[%c0_1, %c0_2] : memref<64x32xf32, #tpu.memory_space<vmem>>, vector<64x32xf32>
    %cst = arith.constant dense<0.000000e+00> : vector<16x32xf32>
    %2 = tpu.matmul %0, %1, %cst {dimension_numbers = #tpu.dot_dimension_numbers<[1], [0], [0], [1], [0, 0, 1, 1], [], []>} : vector<16x64xf32>, vector<64x32xf32>, vector<16x32xf32> -> vector<16x32xf32>
    %c0_3 = arith.constant 0 : index
    %c0_4 = arith.constant 0 : index
    %3 = vector.load %arg2[%c0_3, %c0_4] : memref<1x32xf32, #tpu.memory_space<vmem>>, vector<1x32xf32>
    %4 = vector.broadcast %3 : vector<1x32xf32> to vector<16x32xf32>
    %5 = arith.addf %2, %4 : vector<16x32xf32>
    %c0_5 = arith.constant 0 : index
    %c0_6 = arith.constant 0 : index
    %6 = vector.load %arg3[%c0_5, %c0_6] : memref<32x16xf32, #tpu.memory_space<vmem>>, vector<32x16xf32>
    %c0_7 = arith.constant 0 : index
    %c0_8 = arith.constant 0 : index
    %7 = vector.load %arg4[%c0_7, %c0_8] : memref<1x16xf32, #tpu.memory_space<vmem>>, vector<1x16xf32>
    %8 = vector.shape_cast %7 : vector<1x16xf32> to vector<1x16xf32>
    %9 = vector.broadcast %8 : vector<1x16xf32> to vector<2x16xf32>
    %cst_9 = arith.constant 0.000000e+00 : f32
    %10 = vector.broadcast %cst_9 : f32 to vector<2x32xf32>
    %cst_10 = arith.constant 0.000000e+00 : f32
    %11 = vector.broadcast %cst_10 : f32 to vector<2x16xf32>
    %12 = vector.extract_strided_slice %5 {offsets = [0, 0], sizes = [2, 32], strides = [1, 1]} : vector<16x32xf32> to vector<2x32xf32>
    %cst_11 = arith.constant 0.899999976 : f32
    %13 = vector.broadcast %cst_11 : f32 to vector<2x32xf32>
    %14 = arith.mulf %13, %10 : vector<2x32xf32>
    %15 = arith.addf %14, %12 : vector<2x32xf32>
    %cst_12 = arith.constant 1.000000e+00 : f32
    %16 = vector.broadcast %cst_12 : f32 to vector<2x32xf32>
    %17 = arith.cmpf oge, %15, %16 : vector<2x32xf32>
    %18 = arith.extui %17 : vector<2x32xi1> to vector<2x32xi32>
    %19 = arith.sitofp %18 : vector<2x32xi32> to vector<2x32xf32>
    %cst_13 = arith.constant 1.000000e+00 : f32
    %20 = vector.broadcast %cst_13 : f32 to vector<2x32xf32>
    %21 = arith.mulf %19, %20 : vector<2x32xf32>
    %22 = arith.subf %15, %21 : vector<2x32xf32>
    %cst_14 = arith.constant dense<0.000000e+00> : vector<2x16xf32>
    %23 = tpu.matmul %19, %6, %cst_14 {dimension_numbers = #tpu.dot_dimension_numbers<[1], [0], [0], [1], [0, 0, 1, 1], [], []>} : vector<2x32xf32>, vector<32x16xf32>, vector<2x16xf32> -> vector<2x16xf32>
    %24 = arith.addf %23, %9 : vector<2x16xf32>
    %cst_15 = arith.constant 0.899999976 : f32
    %25 = vector.broadcast %cst_15 : f32 to vector<2x16xf32>
    %26 = arith.mulf %25, %11 : vector<2x16xf32>
    %27 = arith.addf %26, %24 : vector<2x16xf32>
    %cst_16 = arith.constant 1.000000e+00 : f32
    %28 = vector.broadcast %cst_16 : f32 to vector<2x16xf32>
    %29 = arith.cmpf oge, %27, %28 : vector<2x16xf32>
    %30 = arith.extui %29 : vector<2x16xi1> to vector<2x16xi32>
    %31 = arith.sitofp %30 : vector<2x16xi32> to vector<2x16xf32>
    %cst_17 = arith.constant 1.000000e+00 : f32
    %32 = vector.broadcast %cst_17 : f32 to vector<2x16xf32>
    %33 = arith.mulf %31, %32 : vector<2x16xf32>
    %34 = arith.subf %27, %33 : vector<2x16xf32>
    %c0_18 = arith.constant 0 : index
    %c0_19 = arith.constant 0 : index
    %35 = vector.load %arg5[%c0_18, %c0_19] : memref<16x16xf32, #tpu.memory_space<vmem>>, vector<2x16xf32>
    tpu.vector_store %arg5[%c0_18, %c0_19], %31 {strides = array<i32>} : memref<16x16xf32, #tpu.memory_space<vmem>>, vector<2x16xf32>,
    %36 = vector.extract_strided_slice %5 {offsets = [2, 0], sizes = [2, 32], strides = [1, 1]} : vector<16x32xf32> to vector<2x32xf32>
    %cst_20 = arith.constant 0.899999976 : f32
    %37 = vector.broadcast %cst_20 : f32 to vector<2x32xf32>
    %38 = arith.mulf %37, %22 : vector<2x32xf32>
    %39 = arith.addf %38, %36 : vector<2x32xf32>
    %cst_21 = arith.constant 1.000000e+00 : f32
    %40 = vector.broadcast %cst_21 : f32 to vector<2x32xf32>
    %41 = arith.cmpf oge, %39, %40 : vector<2x32xf32>
    %42 = arith.extui %41 : vector<2x32xi1> to vector<2x32xi32>
    %43 = arith.sitofp %42 : vector<2x32xi32> to vector<2x32xf32>
    %cst_22 = arith.constant 1.000000e+00 : f32
    %44 = vector.broadcast %cst_22 : f32 to vector<2x32xf32>
    %45 = arith.mulf %43, %44 : vector<2x32xf32>
    %46 = arith.subf %39, %45 : vector<2x32xf32>
    %cst_23 = arith.constant dense<0.000000e+00> : vector<2x16xf32>
    %47 = tpu.matmul %43, %6, %cst_23 {dimension_numbers = #tpu.dot_dimension_numbers<[1], [0], [0], [1], [0, 0, 1, 1], [], []>} : vector<2x32xf32>, vector<32x16xf32>, vector<2x16xf32> -> vector<2x16xf32>
    %48 = arith.addf %47, %9 : vector<2x16xf32>
    %cst_24 = arith.constant 0.899999976 : f32
    %49 = vector.broadcast %cst_24 : f32 to vector<2x16xf32>
    %50 = arith.mulf %49, %34 : vector<2x16xf32>
    %51 = arith.addf %50, %48 : vector<2x16xf32>
    %cst_25 = arith.constant 1.000000e+00 : f32
    %52 = vector.broadcast %cst_25 : f32 to vector<2x16xf32>
    %53 = arith.cmpf oge, %51, %52 : vector<2x16xf32>
    %54 = arith.extui %53 : vector<2x16xi1> to vector<2x16xi32>
    %55 = arith.sitofp %54 : vector<2x16xi32> to vector<2x16xf32>
    %cst_26 = arith.constant 1.000000e+00 : f32
    %56 = vector.broadcast %cst_26 : f32 to vector<2x16xf32>
    %57 = arith.mulf %55, %56 : vector<2x16xf32>
    %58 = arith.subf %51, %57 : vector<2x16xf32>
    %c2 = arith.constant 2 : index
    %c0_27 = arith.constant 0 : index
    %59 = vector.load %arg5[%c2, %c0_27] : memref<16x16xf32, #tpu.memory_space<vmem>>, vector<2x16xf32>
    tpu.vector_store %arg5[%c2, %c0_27], %55 {strides = array<i32>} : memref<16x16xf32, #tpu.memory_space<vmem>>, vector<2x16xf32>,
    %60 = vector.extract_strided_slice %5 {offsets = [4, 0], sizes = [2, 32], strides = [1, 1]} : vector<16x32xf32> to vector<2x32xf32>
    %cst_28 = arith.constant 0.899999976 : f32
    %61 = vector.broadcast %cst_28 : f32 to vector<2x32xf32>
    %62 = arith.mulf %61, %46 : vector<2x32xf32>
    %63 = arith.addf %62, %60 : vector<2x32xf32>
    %cst_29 = arith.constant 1.000000e+00 : f32
    %64 = vector.broadcast %cst_29 : f32 to vector<2x32xf32>
    %65 = arith.cmpf oge, %63, %64 : vector<2x32xf32>
    %66 = arith.extui %65 : vector<2x32xi1> to vector<2x32xi32>
    %67 = arith.sitofp %66 : vector<2x32xi32> to vector<2x32xf32>
    %cst_30 = arith.constant 1.000000e+00 : f32
    %68 = vector.broadcast %cst_30 : f32 to vector<2x32xf32>
    %69 = arith.mulf %67, %68 : vector<2x32xf32>
    %70 = arith.subf %63, %69 : vector<2x32xf32>
    %cst_31 = arith.constant dense<0.000000e+00> : vector<2x16xf32>
    %71 = tpu.matmul %67, %6, %cst_31 {dimension_numbers = #tpu.dot_dimension_numbers<[1], [0], [0], [1], [0, 0, 1, 1], [], []>} : vector<2x32xf32>, vector<32x16xf32>, vector<2x16xf32> -> vector<2x16xf32>
    %72 = arith.addf %71, %9 : vector<2x16xf32>
    %cst_32 = arith.constant 0.899999976 : f32
    %73 = vector.broadcast %cst_32 : f32 to vector<2x16xf32>
    %74 = arith.mulf %73, %58 : vector<2x16xf32>
    %75 = arith.addf %74, %72 : vector<2x16xf32>
    %cst_33 = arith.constant 1.000000e+00 : f32
    %76 = vector.broadcast %cst_33 : f32 to vector<2x16xf32>
    %77 = arith.cmpf oge, %75, %76 : vector<2x16xf32>
    %78 = arith.extui %77 : vector<2x16xi1> to vector<2x16xi32>
    %79 = arith.sitofp %78 : vector<2x16xi32> to vector<2x16xf32>
    %cst_34 = arith.constant 1.000000e+00 : f32
    %80 = vector.broadcast %cst_34 : f32 to vector<2x16xf32>
    %81 = arith.mulf %79, %80 : vector<2x16xf32>
    %82 = arith.subf %75, %81 : vector<2x16xf32>
    %c4 = arith.constant 4 : index
    %c0_35 = arith.constant 0 : index
    %83 = vector.load %arg5[%c4, %c0_35] : memref<16x16xf32, #tpu.memory_space<vmem>>, vector<2x16xf32>
    tpu.vector_store %arg5[%c4, %c0_35], %79 {strides = array<i32>} : memref<16x16xf32, #tpu.memory_space<vmem>>, vector<2x16xf32>,
    %84 = vector.extract_strided_slice %5 {offsets = [6, 0], sizes = [2, 32], strides = [1, 1]} : vector<16x32xf32> to vector<2x32xf32>
    %cst_36 = arith.constant 0.899999976 : f32
    %85 = vector.broadcast %cst_36 : f32 to vector<2x32xf32>
    %86 = arith.mulf %85, %70 : vector<2x32xf32>
    %87 = arith.addf %86, %84 : vector<2x32xf32>
    %cst_37 = arith.constant 1.000000e+00 : f32
    %88 = vector.broadcast %cst_37 : f32 to vector<2x32xf32>
    %89 = arith.cmpf oge, %87, %88 : vector<2x32xf32>
    %90 = arith.extui %89 : vector<2x32xi1> to vector<2x32xi32>
    %91 = arith.sitofp %90 : vector<2x32xi32> to vector<2x32xf32>
    %cst_38 = arith.constant 1.000000e+00 : f32
    %92 = vector.broadcast %cst_38 : f32 to vector<2x32xf32>
    %93 = arith.mulf %91, %92 : vector<2x32xf32>
    %94 = arith.subf %87, %93 : vector<2x32xf32>
    %cst_39 = arith.constant dense<0.000000e+00> : vector<2x16xf32>
    %95 = tpu.matmul %91, %6, %cst_39 {dimension_numbers = #tpu.dot_dimension_numbers<[1], [0], [0], [1], [0, 0, 1, 1], [], []>} : vector<2x32xf32>, vector<32x16xf32>, vector<2x16xf32> -> vector<2x16xf32>
    %96 = arith.addf %95, %9 : vector<2x16xf32>
    %cst_40 = arith.constant 0.899999976 : f32
    %97 = vector.broadcast %cst_40 : f32 to vector<2x16xf32>
    %98 = arith.mulf %97, %82 : vector<2x16xf32>
    %99 = arith.addf %98, %96 : vector<2x16xf32>
    %cst_41 = arith.constant 1.000000e+00 : f32
    %100 = vector.broadcast %cst_41 : f32 to vector<2x16xf32>
    %101 = arith.cmpf oge, %99, %100 : vector<2x16xf32>
    %102 = arith.extui %101 : vector<2x16xi1> to vector<2x16xi32>
    %103 = arith.sitofp %102 : vector<2x16xi32> to vector<2x16xf32>
    %cst_42 = arith.constant 1.000000e+00 : f32
    %104 = vector.broadcast %cst_42 : f32 to vector<2x16xf32>
    %105 = arith.mulf %103, %104 : vector<2x16xf32>
    %106 = arith.subf %99, %105 : vector<2x16xf32>
    %c6 = arith.constant 6 : index
    %c0_43 = arith.constant 0 : index
    %107 = vector.load %arg5[%c6, %c0_43] : memref<16x16xf32, #tpu.memory_space<vmem>>, vector<2x16xf32>
    tpu.vector_store %arg5[%c6, %c0_43], %103 {strides = array<i32>} : memref<16x16xf32, #tpu.memory_space<vmem>>, vector<2x16xf32>,
    %108 = vector.extract_strided_slice %5 {offsets = [8, 0], sizes = [2, 32], strides = [1, 1]} : vector<16x32xf32> to vector<2x32xf32>
    %cst_44 = arith.constant 0.899999976 : f32
    %109 = vector.broadcast %cst_44 : f32 to vector<2x32xf32>
    %110 = arith.mulf %109, %94 : vector<2x32xf32>
    %111 = arith.addf %110, %108 : vector<2x32xf32>
    %cst_45 = arith.constant 1.000000e+00 : f32
    %112 = vector.broadcast %cst_45 : f32 to vector<2x32xf32>
    %113 = arith.cmpf oge, %111, %112 : vector<2x32xf32>
    %114 = arith.extui %113 : vector<2x32xi1> to vector<2x32xi32>
    %115 = arith.sitofp %114 : vector<2x32xi32> to vector<2x32xf32>
    %cst_46 = arith.constant 1.000000e+00 : f32
    %116 = vector.broadcast %cst_46 : f32 to vector<2x32xf32>
    %117 = arith.mulf %115, %116 : vector<2x32xf32>
    %118 = arith.subf %111, %117 : vector<2x32xf32>
    %cst_47 = arith.constant dense<0.000000e+00> : vector<2x16xf32>
    %119 = tpu.matmul %115, %6, %cst_47 {dimension_numbers = #tpu.dot_dimension_numbers<[1], [0], [0], [1], [0, 0, 1, 1], [], []>} : vector<2x32xf32>, vector<32x16xf32>, vector<2x16xf32> -> vector<2x16xf32>
    %120 = arith.addf %119, %9 : vector<2x16xf32>
    %cst_48 = arith.constant 0.899999976 : f32
    %121 = vector.broadcast %cst_48 : f32 to vector<2x16xf32>
    %122 = arith.mulf %121, %106 : vector<2x16xf32>
    %123 = arith.addf %122, %120 : vector<2x16xf32>
    %cst_49 = arith.constant 1.000000e+00 : f32
    %124 = vector.broadcast %cst_49 : f32 to vector<2x16xf32>
    %125 = arith.cmpf oge, %123, %124 : vector<2x16xf32>
    %126 = arith.extui %125 : vector<2x16xi1> to vector<2x16xi32>
    %127 = arith.sitofp %126 : vector<2x16xi32> to vector<2x16xf32>
    %cst_50 = arith.constant 1.000000e+00 : f32
    %128 = vector.broadcast %cst_50 : f32 to vector<2x16xf32>
    %129 = arith.mulf %127, %128 : vector<2x16xf32>
    %130 = arith.subf %123, %129 : vector<2x16xf32>
    %c8 = arith.constant 8 : index
    %c0_51 = arith.constant 0 : index
    %131 = vector.load %arg5[%c8, %c0_51] : memref<16x16xf32, #tpu.memory_space<vmem>>, vector<2x16xf32>
    tpu.vector_store %arg5[%c8, %c0_51], %127 {strides = array<i32>} : memref<16x16xf32, #tpu.memory_space<vmem>>, vector<2x16xf32>,
    %132 = vector.extract_strided_slice %5 {offsets = [10, 0], sizes = [2, 32], strides = [1, 1]} : vector<16x32xf32> to vector<2x32xf32>
    %cst_52 = arith.constant 0.899999976 : f32
    %133 = vector.broadcast %cst_52 : f32 to vector<2x32xf32>
    %134 = arith.mulf %133, %118 : vector<2x32xf32>
    %135 = arith.addf %134, %132 : vector<2x32xf32>
    %cst_53 = arith.constant 1.000000e+00 : f32
    %136 = vector.broadcast %cst_53 : f32 to vector<2x32xf32>
    %137 = arith.cmpf oge, %135, %136 : vector<2x32xf32>
    %138 = arith.extui %137 : vector<2x32xi1> to vector<2x32xi32>
    %139 = arith.sitofp %138 : vector<2x32xi32> to vector<2x32xf32>
    %cst_54 = arith.constant 1.000000e+00 : f32
    %140 = vector.broadcast %cst_54 : f32 to vector<2x32xf32>
    %141 = arith.mulf %139, %140 : vector<2x32xf32>
    %142 = arith.subf %135, %141 : vector<2x32xf32>
    %cst_55 = arith.constant dense<0.000000e+00> : vector<2x16xf32>
    %143 = tpu.matmul %139, %6, %cst_55 {dimension_numbers = #tpu.dot_dimension_numbers<[1], [0], [0], [1], [0, 0, 1, 1], [], []>} : vector<2x32xf32>, vector<32x16xf32>, vector<2x16xf32> -> vector<2x16xf32>
    %144 = arith.addf %143, %9 : vector<2x16xf32>
    %cst_56 = arith.constant 0.899999976 : f32
    %145 = vector.broadcast %cst_56 : f32 to vector<2x16xf32>
    %146 = arith.mulf %145, %130 : vector<2x16xf32>
    %147 = arith.addf %146, %144 : vector<2x16xf32>
    %cst_57 = arith.constant 1.000000e+00 : f32
    %148 = vector.broadcast %cst_57 : f32 to vector<2x16xf32>
    %149 = arith.cmpf oge, %147, %148 : vector<2x16xf32>
    %150 = arith.extui %149 : vector<2x16xi1> to vector<2x16xi32>
    %151 = arith.sitofp %150 : vector<2x16xi32> to vector<2x16xf32>
    %cst_58 = arith.constant 1.000000e+00 : f32
    %152 = vector.broadcast %cst_58 : f32 to vector<2x16xf32>
    %153 = arith.mulf %151, %152 : vector<2x16xf32>
    %154 = arith.subf %147, %153 : vector<2x16xf32>
    %c10 = arith.constant 10 : index
    %c0_59 = arith.constant 0 : index
    %155 = vector.load %arg5[%c10, %c0_59] : memref<16x16xf32, #tpu.memory_space<vmem>>, vector<2x16xf32>
    tpu.vector_store %arg5[%c10, %c0_59], %151 {strides = array<i32>} : memref<16x16xf32, #tpu.memory_space<vmem>>, vector<2x16xf32>,
    %156 = vector.extract_strided_slice %5 {offsets = [12, 0], sizes = [2, 32], strides = [1, 1]} : vector<16x32xf32> to vector<2x32xf32>
    %cst_60 = arith.constant 0.899999976 : f32
    %157 = vector.broadcast %cst_60 : f32 to vector<2x32xf32>
    %158 = arith.mulf %157, %142 : vector<2x32xf32>
    %159 = arith.addf %158, %156 : vector<2x32xf32>
    %cst_61 = arith.constant 1.000000e+00 : f32
    %160 = vector.broadcast %cst_61 : f32 to vector<2x32xf32>
    %161 = arith.cmpf oge, %159, %160 : vector<2x32xf32>
    %162 = arith.extui %161 : vector<2x32xi1> to vector<2x32xi32>
    %163 = arith.sitofp %162 : vector<2x32xi32> to vector<2x32xf32>
    %cst_62 = arith.constant 1.000000e+00 : f32
    %164 = vector.broadcast %cst_62 : f32 to vector<2x32xf32>
    %165 = arith.mulf %163, %164 : vector<2x32xf32>
    %166 = arith.subf %159, %165 : vector<2x32xf32>
    %cst_63 = arith.constant dense<0.000000e+00> : vector<2x16xf32>
    %167 = tpu.matmul %163, %6, %cst_63 {dimension_numbers = #tpu.dot_dimension_numbers<[1], [0], [0], [1], [0, 0, 1, 1], [], []>} : vector<2x32xf32>, vector<32x16xf32>, vector<2x16xf32> -> vector<2x16xf32>
    %168 = arith.addf %167, %9 : vector<2x16xf32>
    %cst_64 = arith.constant 0.899999976 : f32
    %169 = vector.broadcast %cst_64 : f32 to vector<2x16xf32>
    %170 = arith.mulf %169, %154 : vector<2x16xf32>
    %171 = arith.addf %170, %168 : vector<2x16xf32>
    %cst_65 = arith.constant 1.000000e+00 : f32
    %172 = vector.broadcast %cst_65 : f32 to vector<2x16xf32>
    %173 = arith.cmpf oge, %171, %172 : vector<2x16xf32>
    %174 = arith.extui %173 : vector<2x16xi1> to vector<2x16xi32>
    %175 = arith.sitofp %174 : vector<2x16xi32> to vector<2x16xf32>
    %cst_66 = arith.constant 1.000000e+00 : f32
    %176 = vector.broadcast %cst_66 : f32 to vector<2x16xf32>
    %177 = arith.mulf %175, %176 : vector<2x16xf32>
    %178 = arith.subf %171, %177 : vector<2x16xf32>
    %c12 = arith.constant 12 : index
    %c0_67 = arith.constant 0 : index
    %179 = vector.load %arg5[%c12, %c0_67] : memref<16x16xf32, #tpu.memory_space<vmem>>, vector<2x16xf32>
    tpu.vector_store %arg5[%c12, %c0_67], %175 {strides = array<i32>} : memref<16x16xf32, #tpu.memory_space<vmem>>, vector<2x16xf32>,
    %180 = vector.extract_strided_slice %5 {offsets = [14, 0], sizes = [2, 32], strides = [1, 1]} : vector<16x32xf32> to vector<2x32xf32>
    %cst_68 = arith.constant 0.899999976 : f32
    %181 = vector.broadcast %cst_68 : f32 to vector<2x32xf32>
    %182 = arith.mulf %181, %166 : vector<2x32xf32>
    %183 = arith.addf %182, %180 : vector<2x32xf32>
    %cst_69 = arith.constant 1.000000e+00 : f32
    %184 = vector.broadcast %cst_69 : f32 to vector<2x32xf32>
    %185 = arith.cmpf oge, %183, %184 : vector<2x32xf32>
    %186 = arith.extui %185 : vector<2x32xi1> to vector<2x32xi32>
    %187 = arith.sitofp %186 : vector<2x32xi32> to vector<2x32xf32>
    %cst_70 = arith.constant dense<0.000000e+00> : vector<2x16xf32>
    %188 = tpu.matmul %187, %6, %cst_70 {dimension_numbers = #tpu.dot_dimension_numbers<[1], [0], [0], [1], [0, 0, 1, 1], [], []>} : vector<2x32xf32>, vector<32x16xf32>, vector<2x16xf32> -> vector<2x16xf32>
    %189 = arith.addf %188, %9 : vector<2x16xf32>
    %cst_71 = arith.constant 0.899999976 : f32
    %190 = vector.broadcast %cst_71 : f32 to vector<2x16xf32>
    %191 = arith.mulf %190, %178 : vector<2x16xf32>
    %192 = arith.addf %191, %189 : vector<2x16xf32>
    %cst_72 = arith.constant 1.000000e+00 : f32
    %193 = vector.broadcast %cst_72 : f32 to vector<2x16xf32>
    %194 = arith.cmpf oge, %192, %193 : vector<2x16xf32>
    %195 = arith.extui %194 : vector<2x16xi1> to vector<2x16xi32>
    %196 = arith.sitofp %195 : vector<2x16xi32> to vector<2x16xf32>
    %c14 = arith.constant 14 : index
    %c0_73 = arith.constant 0 : index
    %197 = vector.load %arg5[%c14, %c0_73] : memref<16x16xf32, #tpu.memory_space<vmem>>, vector<2x16xf32>
    tpu.vector_store %arg5[%c14, %c0_73], %196 {strides = array<i32>} : memref<16x16xf32, #tpu.memory_space<vmem>>, vector<2x16xf32>,
    return
  }
}

</mosaic_0001>

<bundles_post_ra>
// kernel: spiking_net_forward.1
= control target key start
LH: loop header
LB: loop body
LE: loop exit
PB: predicated region body
PF: predicated region fallthrough
CT: control target
= control target key end

     0   :  { %vm38_vm0 = vcmask 523264   ;;  %v1126_v5 = vmov 0.0|0.0   ;;  %s1318_s0 = inlined_call_operand.vmem [shape: f32[16,64], index: 0, kind: input, shape index: {}]   ;;  %s1319_s1 = inlined_call_operand.vmem [shape: f32[64,32], index: 1, kind: input, shape index: {}]   ;;  %s1320_s2 = inlined_call_operand.vmem [shape: f32[1,32], index: 2, kind: input, shape index: {}]   ;;  %s1321_s3 = inlined_call_operand.vmem [shape: f32[32,16], index: 3, kind: input, shape index: {}]   ;;  %s1322_s4 = inlined_call_operand.vmem [shape: f32[1,16], index: 4, kind: input, shape index: {}]   ;;  %s1323_s5 = inlined_call_operand.hbm [shape: f32[16,16], index: 5, kind: output, shape index: {}]  }
   0x1   :  { %v23_v0 = vld [vmem:[%s1319_s1] sm:$0xff]  ;;  %v24_v1 = vld [vmem:[%s1319_s1 + $0x8] sm:$0xff]  ;;  %v25_v2 = vld [vmem:[%s1319_s1 + $0x10] sm:$0xff]  ;;  %1048 = vmatprep.subr.bf16.mxu1 %v1126_v5 }
   0x2   :  { %v1032_v3 = vpack.c.bf16 %v24_v1, %v23_v0  ;;  %v26_v4 = vld [vmem:[%s1319_s1 + $0x18] sm:$0xff]  ;;  %v27_v7 = vld [vmem:[%s1319_s1 + $0x20] sm:$0xff]  ;;  %v28_v8 = vld [vmem:[%s1319_s1 + $0x28] sm:$0xff] }
   0x3   :  { %v1036_v6 = vpack.c.bf16 %v26_v4, %v25_v2  ;;  %v21_v9 = vld [vmem:[%s1318_s0] sm:$0xff]  ;;  %v121_v11 = vld [vmem:[%s1321_s3 + $0x8] sm:$0xff] }
   0x4   :  { %1033 = vmatprep.subr.bf16.mxu0 %v1032_v3  ;;  %941 = vmatprep.mubr.msk.f32.mxu0 %vm38_vm0, %v21_v9  ;;  %v120_v10 = vld [vmem:[%s1321_s3] sm:$0xff] }
   0x5   :  { %1035 = vmatpush3.bf16.msra.mxu0 %v1032_v3  ;;  %v1191_v12 = vpack.c.bf16 %v121_v11, %v120_v10 }
   0x6   :  { %10 = vsyncpa [#allocation3], 0  ;;  %1037 = vmatprep.subr.bf16.mxu0 %v1036_v6  ;;  %v1040_v13 = vpack.c.bf16 %v28_v8, %v27_v7  ;;  %v29_v14 = vld [vmem:[%s1319_s1 + $0x30] sm:$0xff]  ;;  %v30_v15 = vld [vmem:[%s1319_s1 + $0x38] sm:$0xff]  ;;  %vm1127_vm1 = vmmov 0   ;;  %v1128_v21 = vmov 0.0  }
   0x7   :  { %1050 = vmatpush3.bf16.msra.mxu1 %v1191_v12  ;;  %v1044_v16 = vpack.c.bf16 %v30_v15, %v29_v14  ;;  %v22_v17 = vld [vmem:[%s1318_s0 + $0x8] sm:$0xff]  ;;  %v122_v18 = vld [vmem:[%s1321_s3 + $0x10] sm:$0xff]  ;;  %v123_v19 = vld [vmem:[%s1321_s3 + $0x18] sm:$0xff]  ;;  %952 = vmatprep.mubr.msk.f32.mxu1 %vm1127_vm1, %v1128_v21  ;;  %vm136_vm2 = vcmask 261120   ;;  %vm215_vm11 = vcmask 123904  }
   0x8   :  { %1051 = vmatprep.subr.bf16.mxu1 %v1126_v5  ;;  %v1214_v20 = vpack.c.bf16 %v123_v19, %v122_v18  ;;  %v847_v22 = vld [vmem:[%s1320_s2] ss:$0 sm:$0xff] }
   0x9   :  { %1039 = vmatpush3.bf16.msra.mxu0 %v1036_v6  ;;  %v1280_v62 = vld [vmem:[%s1322_s4] ss:$0 sm:$0xff]  ;;  %s1129_s4 = smov [#allocation2]  }
   0xa   :  { %1041 = vmatprep.subr.bf16.mxu0 %v1040_v13  ;;  %s836_s21 = sshll.u32 %s1129_s4, 4  ;;  %s837_s21 = int_to_ptr.vmem [resolvable:$true] %s836_s21 }
   0xb   :  { %1053 = vmatpush3.bf16.msra.mxu1 %v1214_v20  ;;  %s1102_s22 = scalar_lea.vmem %s837_s21, 256  ;;  %p1107_p1 = scmp.lt.s32.totalorder %s837_s21, %s837_s21 }
   0xc   :  { %1054 = vmatprep.subr.bf16.mxu1 %v1126_v5  ;;  %p1103_p0 = scmp.ne.s32.totalorder %s837_s21, %s1102_s22  ;;  %p1108_p2 = scmp.lt.s32.totalorder %s1102_s22, %s1102_s22 }
   0xd   :  { %1043 = vmatpush3.bf16.msra.mxu0 %v1040_v13 }
   0xe   :  { %1045 = vmatprep.subr.bf16.mxu0 %v1044_v16  ;;  %p1109_p3 = por %p1108_p2, %p1107_p1 }
  0x10   :  { %p1110_p4 = pnand %p1109_p3, %p1103_p0 }
  0x11   :  { %1047 = vmatpush3.bf16.msra.mxu0 %v1044_v16 }
  0x12   :  { %1060 = vmatprep.subr.bf16.mxu0 %v1126_v5 }
  0x14   :  { %942 = vmatmul.mubr.msk.f32.vlgmr.msra.gmra.mrb[0].mxu0 %vm38_vm0, %v22_v17 }
  0x15   :  { %1062 = vmatpush3.bf16.msra.mxu0 %v1191_v12  ;;  %974 = vmatprep.mubr.msk.f32.mxu0 %vm1127_vm1, %v1128_v21 }
  0x16   :  { %1063 = vmatprep.subr.bf16.mxu0 %v1126_v5 }
  0x19   :  { %1065 = vmatpush3.bf16.msra.mxu0 %v1214_v20 }
  0x1a   :  { %1072 = vmatprep.subr.bf16.mxu0 %v1126_v5 }
  0xe7   :  { %v943_v23 = vpop.f32.mrb[0].mxu0 }
  0xe8   :  { %v111_v24 = vpop.f32.mrb[1].mxu0  ;;  %v117_v43 = vadd.f32 %v943_v23, %v847_v22 }
  0xe9   :  { %v112_v25 = vadd.f32 %v847_v22, %v111_v24 }
  0xea   :  { %v570_v48 = vrot.slane %v117_v43, 2  ;;  %v658_v53 = vrot.slane %v117_v43, 4  ;;  %v746_v58 = vrot.slane %v117_v43, 6 }
  0xeb   :  { %vm132_vm3 = vcmp.ge.f32.partialorder %v112_v25, 1.0  ;;  %v219_v29 = vrot.slane %v112_v25, 2  ;;  %v307_v34 = vrot.slane %v112_v25, 4  ;;  %v395_v39 = vrot.slane %v112_v25, 6 }
  0xec   :  { %v851_v26 = vsel %vm132_vm3, 1.0, %v1128_v21 }
  0xed   :  { %v135_v27 = vsub.f32 %v112_v25, %v851_v26  ;;  %953 = vmatmul.mubr.msk.f32.vlgmr.msra.gmra.mrb[0].mxu1 %vm136_vm2, %v851_v26 }
  0xee   :  { %1056 = vmatpush3.bf16.msra.mxu1 %v1191_v12  ;;  %963 = vmatprep.mubr.msk.f32.mxu1 %vm1127_vm1, %v1128_v21 }
  0xef   :  { %v217_v28 = vmul.f32 0.9, %v135_v27  ;;  %1057 = vmatprep.subr.bf16.mxu1 %v1126_v5 }
  0xf1   :  { %v221_v30 = vadd.f32 %v219_v29, %v217_v28 }
  0xf2   :  { %1059 = vmatpush3.bf16.msra.mxu1 %v1214_v20 }
  0xf3   :  { %vm222_vm4 = vcmp.ge.f32.partialorder %v221_v30, 1.0  ;;  %1066 = vmatprep.subr.bf16.mxu1 %v1126_v5 }
  0xf4   :  { %v854_v31 = vsel %vm222_vm4, 1.0, %v1128_v21 }
  0xf5   :  { %v225_v32 = vsub.f32 %v221_v30, %v854_v31  ;;  %964 = vmatmul.mubr.msk.f32.vlgmr.msra.gmra.mrb[2].mxu1 %vm136_vm2, %v854_v31 }
  0xf6   :  { %1068 = vmatpush3.bf16.msra.mxu1 %v1191_v12  ;;  %985 = vmatprep.mubr.msk.f32.mxu1 %vm1127_vm1, %v1128_v21 }
  0xf7   :  { %v306_v33 = vmul.f32 0.9, %v225_v32  ;;  %1069 = vmatprep.subr.bf16.mxu1 %v1126_v5 }
  0xf9   :  { %v309_v35 = vadd.f32 %v307_v34, %v306_v33 }
  0xfa   :  { %1071 = vmatpush3.bf16.msra.mxu1 %v1214_v20 }
  0xfb   :  { %vm310_vm5 = vcmp.ge.f32.partialorder %v309_v35, 1.0  ;;  %1078 = vmatprep.subr.bf16.mxu1 %v1126_v5 }
  0xfc   :  { %v857_v36 = vsel %vm310_vm5, 1.0, %v1128_v21 }
  0xfd   :  { %v313_v37 = vsub.f32 %v309_v35, %v857_v36  ;;  %975 = vmatmul.mubr.msk.f32.vlgmr.msra.gmra.mrb[2].mxu0 %vm136_vm2, %v857_v36 }
  0xfe   :  { %1074 = vmatpush3.bf16.msra.mxu0 %v1191_v12  ;;  %996 = vmatprep.mubr.msk.f32.mxu0 %vm1127_vm1, %v1128_v21 }
  0xff   :  { %v394_v38 = vmul.f32 0.9, %v313_v37  ;;  %1075 = vmatprep.subr.bf16.mxu0 %v1126_v5 }
 0x101   :  { %v397_v40 = vadd.f32 %v395_v39, %v394_v38 }
 0x102   :  { %1077 = vmatpush3.bf16.msra.mxu0 %v1214_v20 }
 0x103   :  { %vm398_vm6 = vcmp.ge.f32.partialorder %v397_v40, 1.0  ;;  %1084 = vmatprep.subr.bf16.mxu0 %v1126_v5 }
 0x104   :  { %v860_v41 = vsel %vm398_vm6, 1.0, %v1128_v21 }
 0x105   :  { %v401_v42 = vsub.f32 %v397_v40, %v860_v41  ;;  %986 = vmatmul.mubr.msk.f32.vlgmr.msra.gmra.mrb[4].mxu1 %vm136_vm2, %v860_v41 }
 0x106   :  { %1080 = vmatpush3.bf16.msra.mxu1 %v1191_v12  ;;  %1007 = vmatprep.mubr.msk.f32.mxu1 %vm1127_vm1, %v1128_v21 }
 0x107   :  { %v482_v44 = vmul.f32 0.9, %v401_v42  ;;  %1081 = vmatprep.subr.bf16.mxu1 %v1126_v5 }
 0x109   :  { %v483_v45 = vadd.f32 %v482_v44, %v117_v43 }
 0x10a   :  { %1083 = vmatpush3.bf16.msra.mxu1 %v1214_v20 }
 0x10b   :  { %vm484_vm7 = vcmp.ge.f32.partialorder %v483_v45, 1.0  ;;  %1090 = vmatprep.subr.bf16.mxu1 %v1126_v5 }
 0x10c   :  { %v863_v46 = vsel %vm484_vm7, 1.0, %v1128_v21 }
 0x10d   :  { %v487_v47 = vsub.f32 %v483_v45, %v863_v46  ;;  %997 = vmatmul.mubr.msk.f32.vlgmr.msra.gmra.mrb[4].mxu0 %vm136_vm2, %v863_v46 }
 0x10e   :  { %1086 = vmatpush3.bf16.msra.mxu0 %v1191_v12  ;;  %1018 = vmatprep.mubr.msk.f32.mxu0 %vm1127_vm1, %v1128_v21 }
 0x10f   :  { %v568_v49 = vmul.f32 0.9, %v487_v47  ;;  %1087 = vmatprep.subr.bf16.mxu0 %v1126_v5 }
 0x111   :  { %v572_v50 = vadd.f32 %v570_v48, %v568_v49 }
 0x112   :  { %1089 = vmatpush3.bf16.msra.mxu0 %v1214_v20 }
 0x113   :  { %vm573_vm8 = vcmp.ge.f32.partialorder %v572_v50, 1.0 }
 0x114   :  { %v866_v51 = vsel %vm573_vm8, 1.0, %v1128_v21 }
 0x115   :  { %v576_v52 = vsub.f32 %v572_v50, %v866_v51  ;;  %1008 = vmatmul.mubr.msk.f32.vlgmr.msra.gmra.mrb[6].mxu1 %vm136_vm2, %v866_v51 }
 0x116   :  { %1092 = vmatpush3.bf16.msra.mxu1 %v1191_v12  ;;  %1029 = vmatprep.mubr.msk.f32.mxu1 %vm1127_vm1, %v1128_v21 }
 0x117   :  { %v657_v54 = vmul.f32 0.9, %v576_v52  ;;  %1093 = vmatprep.subr.bf16.mxu1 %v1126_v5 }
 0x119   :  { %v660_v55 = vadd.f32 %v658_v53, %v657_v54 }
 0x11a   :  { %1095 = vmatpush3.bf16.msra.mxu1 %v1214_v20 }
 0x11b   :  { %vm661_vm9 = vcmp.ge.f32.partialorder %v660_v55, 1.0 }
 0x11c   :  { %v869_v56 = vsel %vm661_vm9, 1.0, %v1128_v21 }
 0x11d   :  { %v664_v57 = vsub.f32 %v660_v55, %v869_v56  ;;  %1019 = vmatmul.mubr.msk.f32.vlgmr.msra.gmra.mrb[6].mxu0 %vm136_vm2, %v869_v56 }
 0x11f   :  { %v745_v59 = vmul.f32 0.9, %v664_v57 }
 0x121   :  { %v748_v60 = vadd.f32 %v746_v58, %v745_v59 }
 0x123   :  { %vm749_vm10 = vcmp.ge.f32.partialorder %v748_v60, 1.0 }
 0x124   :  { %v872_v61 = vsel %vm749_vm10, 1.0, %v1128_v21 }
 0x125   :  { %1030 = vmatmul.mubr.msk.f32.vlgmr.msra.gmra.mrb[8].mxu1 %vm136_vm2, %v872_v61 }
 0x1c0   :  { %v206_v63 = vpop.f32.mrb[0].mxu1 }
 0x1c1   :  { %v207_v0 = vadd.f32 %v1280_v62, %v206_v63  ;;  %v954_v1 = vpop.f32.mrb[1].mxu1 }
 0x1c3   :  { %vm211_vm12 = vcmp.ge.f32.partialorder %v207_v0, 1.0 }
 0x1c4   :  { %v853_v2 = vsel %vm211_vm12, 1.0, %v1128_v21 }
 0x1c5   :  { %v214_v3 = vsub.f32 %v207_v0, %v853_v2  ;;  %216 = vst.msk [vmem:[#allocation2] sm:$0x3] %vm215_vm11, %v853_v2 }
 0x1c7   :  { %v299_v5 = vmul.f32 0.9, %v214_v3 }
 0x1c8   :  { %v295_v4 = vpop.f32.mrb[2].mxu1 }
 0x1c9   :  { %v296_v6 = vadd.f32 %v1280_v62, %v295_v4  ;;  %v965_v7 = vpop.f32.mrb[3].mxu1 }
 0x1cb   :  { %v300_v8 = vadd.f32 %v299_v5, %v296_v6 }
 0x1cd   :  { %vm301_vm13 = vcmp.ge.f32.partialorder %v300_v8, 1.0 }
 0x1ce   :  { %v856_v9 = vsel %vm301_vm13, 1.0, %v1128_v21 }
 0x1cf   :  { %v304_v10 = vsub.f32 %v300_v8, %v856_v9  ;;  %305 = vst.msk [vmem:[#allocation2 + $0x2] sm:$0x3] %vm215_vm11, %v856_v9 }
 0x1d0   :  { %v383_v11 = vpop.f32.mrb[2].mxu0 }
 0x1d1   :  { %v384_v12 = vadd.f32 %v1280_v62, %v383_v11  ;;  %v387_v13 = vmul.f32 0.9, %v304_v10  ;;  %v976_v14 = vpop.f32.mrb[3].mxu0 }
 0x1d3   :  { %v388_v15 = vadd.f32 %v387_v13, %v384_v12 }
 0x1d5   :  { %vm389_vm14 = vcmp.ge.f32.partialorder %v388_v15, 1.0 }
 0x1d6   :  { %v859_v16 = vsel %vm389_vm14, 1.0, %v1128_v21 }
 0x1d7   :  { %v392_v17 = vsub.f32 %v388_v15, %v859_v16  ;;  %393 = vst.msk [vmem:[#allocation2 + $0x4] sm:$0x3] %vm215_vm11, %v859_v16 }
 0x1d8   :  { %v471_v18 = vpop.f32.mrb[4].mxu1 }
 0x1d9   :  { %v472_v19 = vadd.f32 %v1280_v62, %v471_v18  ;;  %v475_v20 = vmul.f32 0.9, %v392_v17  ;;  %v987_v22 = vpop.f32.mrb[5].mxu1 }
 0x1db   :  { %v476_v23 = vadd.f32 %v475_v20, %v472_v19 }
 0x1dd   :  { %vm477_vm15 = vcmp.ge.f32.partialorder %v476_v23, 1.0 }
 0x1de   :  { %v862_v24 = vsel %vm477_vm15, 1.0, %v1128_v21 }
 0x1df   :  { %v480_v25 = vsub.f32 %v476_v23, %v862_v24  ;;  %481 = vst.msk [vmem:[#allocation2 + $0x6] sm:$0x3] %vm215_vm11, %v862_v24 }
 0x1e0   :  { %v557_v26 = vpop.f32.mrb[4].mxu0 }
 0x1e1   :  { %v558_v27 = vadd.f32 %v1280_v62, %v557_v26  ;;  %v561_v28 = vmul.f32 0.9, %v480_v25  ;;  %v998_v29 = vpop.f32.mrb[5].mxu0 }
 0x1e3   :  { %v562_v30 = vadd.f32 %v561_v28, %v558_v27 }
 0x1e5   :  { %vm563_vm0 = vcmp.ge.f32.partialorder %v562_v30, 1.0 }
 0x1e6   :  { %v865_v31 = vsel %vm563_vm0, 1.0, %v1128_v21 }
 0x1e7   :  { %v566_v32 = vsub.f32 %v562_v30, %v865_v31  ;;  %567 = vst.msk [vmem:[#allocation2 + $0x8] sm:$0x3] %vm215_vm11, %v865_v31 }
 0x1e8   :  { %v646_v33 = vpop.f32.mrb[6].mxu1 }
 0x1e9   :  { %v647_v34 = vadd.f32 %v1280_v62, %v646_v33  ;;  %v650_v35 = vmul.f32 0.9, %v566_v32  ;;  %v1009_v36 = vpop.f32.mrb[7].mxu1 }
 0x1eb   :  { %v651_v37 = vadd.f32 %v650_v35, %v647_v34 }
 0x1ed   :  { %vm652_vm1 = vcmp.ge.f32.partialorder %v651_v37, 1.0 }
 0x1ee   :  { %v868_v38 = vsel %vm652_vm1, 1.0, %v1128_v21 }
 0x1ef   :  { %v655_v39 = vsub.f32 %v651_v37, %v868_v38  ;;  %656 = vst.msk [vmem:[#allocation2 + $0xa] sm:$0x3] %vm215_vm11, %v868_v38 }
 0x1f0   :  { %v734_v40 = vpop.f32.mrb[6].mxu0 }
 0x1f1   :  { %v735_v41 = vadd.f32 %v1280_v62, %v734_v40  ;;  %v738_v42 = vmul.f32 0.9, %v655_v39  ;;  %v1020_v43 = vpop.f32.mrb[7].mxu0 }
 0x1f3   :  { %v739_v44 = vadd.f32 %v738_v42, %v735_v41 }
 0x1f5   :  { %vm740_vm2 = vcmp.ge.f32.partialorder %v739_v44, 1.0 }
 0x1f6   :  { %v871_v45 = vsel %vm740_vm2, 1.0, %v1128_v21 }
 0x1f7   :  { %v743_v46 = vsub.f32 %v739_v44, %v871_v45  ;;  %744 = vst.msk [vmem:[#allocation2 + $0xc] sm:$0x3] %vm215_vm11, %v871_v45 }
 0x1f8   :  { %v821_v47 = vpop.f32.mrb[8].mxu1 }
 0x1f9   :  { %v822_v48 = vadd.f32 %v1280_v62, %v821_v47  ;;  %v825_v49 = vmul.f32 0.9, %v743_v46  ;;  %v1031_v50 = vpop.f32.mrb[9].mxu1 }
 0x1fb   :  { %v826_v51 = vadd.f32 %v825_v49, %v822_v48 }
 0x1fd   :  { %vm827_vm3 = vcmp.ge.f32.partialorder %v826_v51, 1.0 }
 0x1fe   :  { %v874_v52 = vsel %vm827_vm3, 1.0, %v1128_v21 }
 0x1ff   :  { %830 = vst.msk [vmem:[#allocation2 + $0xe] sm:$0x3] %vm215_vm11, %v874_v52 }
 0x200   :  { %1113 = shalt.err (!%p1110_p4)
}
 0x201   :  { %s1114_s25 = scalar_lea.hbm %s1323_s5, 256 }
 0x202   :  { %p1115_p5 = scmp.ne.s32.totalorder %s1323_s5, %s1114_s25  ;;  %p1118_p6 = scmp.lt.u32.totalorder %s1114_s25, %s1323_s5 }
 0x204   :  { %p1120_p7 = pnand %p1118_p6, %p1115_p5 }
 0x206   :  { %1123 = shalt.err (!%p1120_p7)
}
 0x207   :  { %s1130_s30 = smov 128   ;;  %s1131_s6 = smov 8  }
 0x208   :  { %842 = dma.vmem_to_hbm [thread:$0]  %s837_s21, 256, %s1323_s5, [#allocation3], %s1130_s30, %s1130_s30, %s1131_s6  }
 0x209   :  { %1124 = dma.done.wait [#allocation3], 256  }
 0x20a   :  { %1125 = vsyncadd [#allocation3], 4294967040 }
 0x20b   :  { %846 = vsyncpa [#allocation3], 1 }

</bundles_post_ra>
